<compile_context>
chip_gen: v7x
topology: tpu7x:2x2x1
jax: 0.10.0
libtpu: 0.0.40
codegen_flags: <defaults>
</compile_context>

<pallas_src>
import math
from functools import partial

import jax
import jax.numpy as jnp
from jax import lax
from jax.experimental import pallas as pl
from jax.experimental.pallas import tpu as pltpu


_VMEM_LIMIT = 32 * 1024 * 1024   # safe scoped budget on v5e / v6e / v7x


# ---------------------------------------------------------------------------
# Kernel 1: 1x1 conv (HW on lane axis) + positional add + fused avg-pool.
# grid = (B, HW_tiles); batch "parallel", HW-tile "arbitrary" (pool accumulator).
# ---------------------------------------------------------------------------
def _proj_kernel(src_ref, wpt_ref, bp_ref, pos_ref, mem_ref, feat_ref, *, inv_hw):
    t = pl.program_id(1)

    # 1x1 conv == channel matmul: (D, Cin) @ (Cin, T) -> (D, T); T on lanes.
    proj = jnp.dot(wpt_ref[...], src_ref[0],
                   preferred_element_type=jnp.float32) + bp_ref[...]
    mem_ref[0] = proj + pos_ref[0]            # transformer memory = proj + pos

    # AdaptiveAvgPool2d(1): accumulate the spatial sum in the resident output
    # block across HW tiles (proj itself never goes back to HBM).
    @pl.when(t == 0)
    def _():
        feat_ref[...] = jnp.zeros_like(feat_ref)

    feat_ref[0] += jnp.sum(proj, axis=-1, keepdims=True)      # (D, 1)

    @pl.when(t == pl.num_programs(1) - 1)
    def _():
        feat_ref[...] = feat_ref[...] * inv_hw                # sum -> mean


# ---------------------------------------------------------------------------
# Kernel 2: fused cross-attention + GroupWiseLinear + fc_mlp, gridded over B.
# ---------------------------------------------------------------------------
def _attn_head_kernel(q_ref, mem_ref, wgw_ref, bgw_ref, feat_ref,
                      wmlpT_ref, bmlp_ref, sim_ref, y_ref, mlp_ref, *, scale):
    mem = mem_ref[0]                                  # (D, HW)
    q = q_ref[...]                                    # (C, D)

    # scores (C, HW): one MXU matmul, HW stays on the lane axis.
    s = jnp.dot(q, mem, preferred_element_type=jnp.float32) * scale
    s = s - jnp.max(s, axis=-1, keepdims=True)
    e = jnp.exp(s)
    p = e * pl.reciprocal(jnp.sum(e, axis=-1, keepdims=True), approx=True)
    sim_ref[0] = p                                    # softmax attention map

    # hs (C, D): contract the HW (last) dim of both operands -> single matmul.
    hs = lax.dot_general(p, mem, (((1,), (1,)), ((), ())),
                         preferred_element_type=jnp.float32)

    # GroupWiseLinear: y[c] = sum_d W[c, d] * hs[c, d] + b[c]
    y_ref[0] = jnp.sum(wgw_ref[...] * hs, axis=-1, keepdims=True) + bgw_ref[...]

    # fc_mlp on the pooled feature: (M, D) @ (D, 1) -> (M, 1)
    mlp_ref[0] = jnp.dot(wmlpT_ref[...], feat_ref[0],
                         preferred_element_type=jnp.float32) + bmlp_ref[...]


# ---------------------------------------------------------------------------
# pallas_call wrappers
# ---------------------------------------------------------------------------
def input_proj_and_pool(src3, pos3, WpT, bp, *, tile_hw=512):
    B, Cin, HW = src3.shape
    D = WpT.shape[0]
    T = min(tile_hw, HW)
    if HW % T != 0:          # fallback: one full-HW block per batch
        T = HW
    nt = HW // T

    kernel = partial(_proj_kernel, inv_hw=1.0 / HW)
    return pl.pallas_call(
        kernel,
        grid=(B, nt),
        in_specs=[
            pl.BlockSpec((1, Cin, T), lambda b, t: (b, 0, t)),   # src
            pl.BlockSpec((D, Cin), lambda b, t: (0, 0)),         # Wp^T
            pl.BlockSpec((D, 1), lambda b, t: (0, 0)),           # conv bias
            pl.BlockSpec((1, D, T), lambda b, t: (b, 0, t)),     # pos
        ],
        out_specs=(
            pl.BlockSpec((1, D, T), lambda b, t: (b, 0, t)),     # mem
            pl.BlockSpec((1, D, 1), lambda b, t: (b, 0, 0)),     # pooled feat
        ),
        out_shape=(jax.ShapeDtypeStruct((B, D, HW), jnp.float32),
                   jax.ShapeDtypeStruct((B, D, 1), jnp.float32)),
        compiler_params=pltpu.CompilerParams(
            dimension_semantics=("parallel", "arbitrary"),
            vmem_limit_bytes=_VMEM_LIMIT),
    )(src3, WpT, bp, pos3)


def attention_and_heads(q, mem, W_gw, b_gw, feat, W_mlpT, b_mlp):
    C, D = q.shape
    B, _, HW = mem.shape
    M = W_mlpT.shape[0]

    kernel = partial(_attn_head_kernel, scale=1.0 / math.sqrt(D))
    return pl.pallas_call(
        kernel,
        grid=(B,),
        in_specs=[
            pl.BlockSpec((C, D), lambda b: (0, 0)),              # query_embed
            pl.BlockSpec((1, D, HW), lambda b: (b, 0, 0)),       # memory
            pl.BlockSpec((C, D), lambda b: (0, 0)),              # GroupWiseLinear W
            pl.BlockSpec((C, 1), lambda b: (0, 0)),              # GroupWiseLinear b
            pl.BlockSpec((1, D, 1), lambda b: (b, 0, 0)),        # pooled feat
            pl.BlockSpec((M, D), lambda b: (0, 0)),              # fc_mlp W (out, in)
            pl.BlockSpec((M, 1), lambda b: (0, 0)),              # fc_mlp b
        ],
        out_specs=(
            pl.BlockSpec((1, C, HW), lambda b: (b, 0, 0)),       # sim_mat_2
            pl.BlockSpec((1, C, 1), lambda b: (b, 0, 0)),        # y_ivt
            pl.BlockSpec((1, M, 1), lambda b: (b, 0, 0)),        # out_mlp
        ),
        out_shape=(jax.ShapeDtypeStruct((B, C, HW), jnp.float32),
                   jax.ShapeDtypeStruct((B, C, 1), jnp.float32),
                   jax.ShapeDtypeStruct((B, M, 1), jnp.float32)),
        compiler_params=pltpu.CompilerParams(
            dimension_semantics=("parallel",),
            vmem_limit_bytes=_VMEM_LIMIT),
    )(q, mem, W_gw, b_gw, feat, W_mlpT, b_mlp)


# ---------------------------------------------------------------------------
# Forward (matches Qeruy2Label.forward: returns (x, out_mlp, y_ivt, sim_mat_2))
# ---------------------------------------------------------------------------
def qeruy2label_forward(src_list, pos_list, params):
    src = src_list[-1]                        # (B, Cin, H, W)  NCHW
    pos = pos_list[-1]                        # (B, D,   H, W)  NCHW
    B, Cin, H, W = src.shape
    D = params['WpT'].shape[0]
    HW = H * W

    # NCHW kept: only cheap reshapes (no HBM transpose passes).
    src3 = src.reshape(B, Cin, HW)
    pos3 = pos.reshape(B, D, HW)

    mem, feat = input_proj_and_pool(src3, pos3, params['WpT'], params['bp'])

    sim_mat_2, y_col, mlp_col = attention_and_heads(
        params['query_embed'], mem, params['W_gw'], params['b_gw'],
        feat, params['W_mlpT'], params['b_mlp'])

    x = feat.reshape(B, D)                    # AdaptiveAvgPool2d(1) output
    out_mlp = mlp_col.reshape(B, -1)
    y_ivt = y_col.reshape(B, -1)
    return x, out_mlp, y_ivt, sim_mat_2


# ---------------------------------------------------------------------------
# Deterministic parameter init (shapes from the module's __init__)
# ---------------------------------------------------------------------------
def init_params(key, input_channels, hidden_dim, num_class, mlp_out=128):
    ks = jax.random.split(key, 8)
    f32 = jnp.float32
    stdv_conv = 1.0 / math.sqrt(input_channels)
    stdv = 1.0 / math.sqrt(hidden_dim)
    return {
        # input_proj: Conv2d(Cin, D, k=1) -> stored as (D, Cin) for W^T @ x
        'WpT': jax.random.uniform(ks[0], (hidden_dim, input_channels),
                                  minval=-stdv_conv, maxval=stdv_conv, dtype=f32),
        'bp': jax.random.uniform(ks[1], (hidden_dim, 1),
                                 minval=-stdv_conv, maxval=stdv_conv, dtype=f32),
        # query_embed: Embedding(num_class, D)
        'query_embed': jax.random.normal(ks[2], (num_class, hidden_dim), dtype=f32),
        # GroupWiseLinear
        'W_gw': jax.random.uniform(ks[3], (num_class, hidden_dim),
                                   minval=-stdv, maxval=stdv, dtype=f32),
        'b_gw': jax.random.uniform(ks[4], (num_class, 1),
                                   minval=-stdv, maxval=stdv, dtype=f32),
        # fc_mlp: Linear(D, 128) -> stored like PyTorch, (out, in) = (128, D)
        'W_mlpT': jax.random.uniform(ks[5], (mlp_out, hidden_dim),
                                     minval=-stdv, maxval=stdv, dtype=f32),
        'b_mlp': jax.random.uniform(ks[6], (mlp_out, 1),
                                    minval=-stdv, maxval=stdv, dtype=f32),
    }


if __name__ == "__main__":
    B, Cin, H, W = 2, 4, 16, 16
    hidden_dim = 32          # transformer.d_model
    num_class = 8

    key = jax.random.PRNGKey(0)
    k_p, k_src, k_pos = jax.random.split(key, 3)
    params = init_params(k_p, Cin, hidden_dim, num_class)

    src = jax.random.normal(k_src, (B, Cin, H, W), dtype=jnp.float32)
    pos = jax.random.normal(k_pos, (B, hidden_dim, H, W), dtype=jnp.float32)

    # module takes lists and uses src[-1], pos[-1]
    x, out_mlp, y_ivt, sim_mat_2 = qeruy2label_forward([src], [pos], params)
    jax.block_until_ready((x, out_mlp, y_ivt, sim_mat_2))

    assert x.shape == (B, hidden_dim)
    assert out_mlp.shape == (B, 128)
    assert y_ivt.shape == (B, num_class)
    assert sim_mat_2.shape == (B, num_class, H * W)
    print("KERNEL_OK")
</pallas_src>

<mosaic_0001>
module attributes {stable_mosaic.version = 11 : i64} {
  func.func @_proj_kernel(%arg0: i32, %arg1: i32, %arg2: memref<1x4x256xf32, #tpu.memory_space<vmem>>, %arg3: memref<32x4xf32, #tpu.memory_space<vmem>>, %arg4: memref<32x1xf32, #tpu.memory_space<vmem>>, %arg5: memref<1x32x256xf32, #tpu.memory_space<vmem>>, %arg6: memref<1x32x256xf32, #tpu.memory_space<vmem>>, %arg7: memref<1x32x1xf32, #tpu.memory_space<vmem>>) attributes {dimension_semantics = [#tpu.dimension_semantics<parallel>, #tpu.dimension_semantics<arbitrary>], iteration_bounds = array<i64: 2, 1>, scalar_prefetch = 0 : i64, scratch_operands = 0 : i64, tpu.core_type = #tpu.core_type<tc>, window_params = [{transform_indices = @transform_0, window_bounds = array<i64: 1, 4, 256>}, {pipeline_mode = #tpu.pipeline_mode<synchronous>, transform_indices = @transform_1, window_bounds = array<i64: 32, 4>}, {pipeline_mode = #tpu.pipeline_mode<synchronous>, transform_indices = @transform_2, window_bounds = array<i64: 32, 1>}, {transform_indices = @transform_3, window_bounds = array<i64: 1, 32, 256>}, {transform_indices = @transform_4, window_bounds = array<i64: 1, 32, 256>}, {transform_indices = @transform_5, window_bounds = array<i64: 1, 32, 1>}]} {
    %c0 = arith.constant 0 : index
    %c0_0 = arith.constant 0 : index
    %0 = vector.load %arg3[%c0, %c0_0] : memref<32x4xf32, #tpu.memory_space<vmem>>, vector<32x4xf32>
    %c0_1 = arith.constant 0 : index
    %c0_2 = arith.constant 0 : index
    %c0_3 = arith.constant 0 : index
    %1 = vector.load %arg2[%c0_1, %c0_2, %c0_3] : memref<1x4x256xf32, #tpu.memory_space<vmem>>, vector<1x4x256xf32>
    %2 = vector.shape_cast %1 : vector<1x4x256xf32> to vector<4x256xf32>
    %cst = arith.constant dense<0.000000e+00> : vector<32x256xf32>
    %3 = tpu.matmul %0, %2, %cst {dimension_numbers = #tpu.dot_dimension_numbers<[1], [0], [0], [1], [0, 0, 1, 1], [], []>} : vector<32x4xf32>, vector<4x256xf32>, vector<32x256xf32> -> vector<32x256xf32>
    %c0_4 = arith.constant 0 : index
    %c0_5 = arith.constant 0 : index
    %4 = vector.load %arg4[%c0_4, %c0_5] : memref<32x1xf32, #tpu.memory_space<vmem>>, vector<32x1xf32>
    %5 = vector.broadcast %4 : vector<32x1xf32> to vector<32x256xf32>
    %6 = arith.addf %3, %5 : vector<32x256xf32>
    %c0_6 = arith.constant 0 : index
    %c0_7 = arith.constant 0 : index
    %c0_8 = arith.constant 0 : index
    %7 = vector.load %arg5[%c0_6, %c0_7, %c0_8] : memref<1x32x256xf32, #tpu.memory_space<vmem>>, vector<1x32x256xf32>
    %8 = vector.shape_cast %7 : vector<1x32x256xf32> to vector<32x256xf32>
    %9 = arith.addf %6, %8 : vector<32x256xf32>
    %c0_9 = arith.constant 0 : index
    %c0_10 = arith.constant 0 : index
    %c0_11 = arith.constant 0 : index
    %10 = vector.load %arg6[%c0_9, %c0_10, %c0_11] : memref<1x32x256xf32, #tpu.memory_space<vmem>>, vector<1x32x256xf32>
    %11 = vector.shape_cast %10 : vector<1x32x256xf32> to vector<32x256xf32>
    %12 = vector.shape_cast %9 : vector<32x256xf32> to vector<1x32x256xf32>
    tpu.vector_store %arg6[%c0_9, %c0_10, %c0_11], %12 {strides = array<i32>} : memref<1x32x256xf32, #tpu.memory_space<vmem>>, vector<1x32x256xf32>,
    %c0_i32 = arith.constant 0 : i32
    %13 = arith.cmpi eq, %arg1, %c0_i32 : i32
    %14 = arith.extui %13 : i1 to i32
    %c0_i32_12 = arith.constant 0 : i32
    %15 = arith.cmpi ne, %14, %c0_i32_12 : i32
    scf.if %15 {
      %cst_22 = arith.constant 0.000000e+00 : f32
      %27 = vector.broadcast %cst_22 : f32 to vector<1x32x1xf32>
      %c0_23 = arith.constant 0 : index
      %c0_24 = arith.constant 0 : index
      %c0_25 = arith.constant 0 : index
      %28 = vector.load %arg7[%c0_23, %c0_24, %c0_25] : memref<1x32x1xf32, #tpu.memory_space<vmem>>, vector<1x32x1xf32>
      tpu.vector_store %arg7[%c0_23, %c0_24, %c0_25], %27 {strides = array<i32>} : memref<1x32x1xf32, #tpu.memory_space<vmem>>, vector<1x32x1xf32>,
    } else {
    }
    %c0_13 = arith.constant 0 : index
    %c0_14 = arith.constant 0 : index
    %c0_15 = arith.constant 0 : index
    %16 = vector.load %arg7[%c0_13, %c0_14, %c0_15] : memref<1x32x1xf32, #tpu.memory_space<vmem>>, vector<1x32x1xf32>
    %17 = vector.shape_cast %16 : vector<1x32x1xf32> to vector<32x1xf32>
    %cst_16 = arith.constant dense<0.000000e+00> : vector<32xf32>
    %18 = vector.multi_reduction <add>, %6, %cst_16 [1] : vector<32x256xf32> to vector<32xf32>
    %19 = vector.shape_cast %18 : vector<32xf32> to vector<32x1xf32>
    %20 = arith.addf %17, %19 : vector<32x1xf32>
    %c0_17 = arith.constant 0 : index
    %c0_18 = arith.constant 0 : index
    %c0_19 = arith.constant 0 : index
    %21 = vector.load %arg7[%c0_17, %c0_18, %c0_19] : memref<1x32x1xf32, #tpu.memory_space<vmem>>, vector<1x32x1xf32>
    %22 = vector.shape_cast %21 : vector<1x32x1xf32> to vector<32x1xf32>
    %23 = vector.shape_cast %20 : vector<32x1xf32> to vector<1x32x1xf32>
    tpu.vector_store %arg7[%c0_17, %c0_18, %c0_19], %23 {strides = array<i32>} : memref<1x32x1xf32, #tpu.memory_space<vmem>>, vector<1x32x1xf32>,
    %c0_i32_20 = arith.constant 0 : i32
    %24 = arith.cmpi eq, %arg1, %c0_i32_20 : i32
    %25 = arith.extui %24 : i1 to i32
    %c0_i32_21 = arith.constant 0 : i32
    %26 = arith.cmpi ne, %25, %c0_i32_21 : i32
    scf.if %26 {
      %c0_22 = arith.constant 0 : index
      %c0_23 = arith.constant 0 : index
      %c0_24 = arith.constant 0 : index
      %27 = vector.load %arg7[%c0_22, %c0_23, %c0_24] : memref<1x32x1xf32, #tpu.memory_space<vmem>>, vector<1x32x1xf32>
      %cst_25 = arith.constant 3.906250e-03 : f32
      %28 = vector.broadcast %cst_25 : f32 to vector<1x32x1xf32>
      %29 = arith.mulf %27, %28 : vector<1x32x1xf32>
      %c0_26 = arith.constant 0 : index
      %c0_27 = arith.constant 0 : index
      %c0_28 = arith.constant 0 : index
      %30 = vector.load %arg7[%c0_26, %c0_27, %c0_28] : memref<1x32x1xf32, #tpu.memory_space<vmem>>, vector<1x32x1xf32>
      tpu.vector_store %arg7[%c0_26, %c0_27, %c0_28], %29 {strides = array<i32>} : memref<1x32x1xf32, #tpu.memory_space<vmem>>, vector<1x32x1xf32>,
    } else {
    }
    return
  }
  func.func @transform_0(%arg0: i32, %arg1: i32) -> (i32, i32, i32) {
    %c0_i32 = arith.constant 0 : i32
    %c0_i32_0 = arith.constant 0 : i32
    return %arg0, %c0_i32, %arg1 : i32, i32, i32
  }
  func.func @transform_1(%arg0: i32, %arg1: i32) -> (i32, i32) {
    %c0_i32 = arith.constant 0 : i32
    %c0_i32_0 = arith.constant 0 : i32
    %c0_i32_1 = arith.constant 0 : i32
    return %c0_i32, %c0_i32_0 : i32, i32
  }
  func.func @transform_2(%arg0: i32, %arg1: i32) -> (i32, i32) {
    %c0_i32 = arith.constant 0 : i32
    %c0_i32_0 = arith.constant 0 : i32
    %c0_i32_1 = arith.constant 0 : i32
    return %c0_i32, %c0_i32_0 : i32, i32
  }
  func.func @transform_3(%arg0: i32, %arg1: i32) -> (i32, i32, i32) {
    %c0_i32 = arith.constant 0 : i32
    %c0_i32_0 = arith.constant 0 : i32
    return %arg0, %c0_i32, %arg1 : i32, i32, i32
  }
  func.func @transform_4(%arg0: i32, %arg1: i32) -> (i32, i32, i32) {
    %c0_i32 = arith.constant 0 : i32
    %c0_i32_0 = arith.constant 0 : i32
    return %arg0, %c0_i32, %arg1 : i32, i32, i32
  }
  func.func @transform_5(%arg0: i32, %arg1: i32) -> (i32, i32, i32) {
    %c0_i32 = arith.constant 0 : i32
    %c0_i32_0 = arith.constant 0 : i32
    %c0_i32_1 = arith.constant 0 : i32
    return %arg0, %c0_i32, %c0_i32_0 : i32, i32, i32
  }
}

</mosaic_0001>

<bundles_post_ra>
// kernel: tpu_custom_call.1
= control target key start
LH: loop header
LB: loop body
LE: loop exit
PB: predicated region body
PF: predicated region fallthrough
CT: control target
= control target key end

     0   :  { %11 = vsyncpa [#allocation3], 0  ;;  %s1194_s0 = inlined_call_operand.vmem [shape: f32[2,4,256], index: 0, kind: input, shape index: {}]   ;;  %s1195_s1 = inlined_call_operand.vmem [shape: f32[32,4], index: 1, kind: input, shape index: {}]   ;;  %s1196_s2 = inlined_call_operand.vmem [shape: f32[32,1], index: 2, kind: input, shape index: {}]   ;;  %s1197_s3 = inlined_call_operand.hbm [shape: f32[2,32,256], index: 3, kind: input, shape index: {}]   ;;  %s1198_s4 = inlined_call_operand.hbm [shape: f32[2,32,256], index: 4, kind: output, shape index: {0}]   ;;  %s1199_s5 = inlined_call_operand.vmem [shape: f32[2,32,1], index: 5, kind: output, shape index: {1}]  }
   0x1   :  { %13 = vsyncpa [#allocation3 + $0x1], 0 }
   0x2   :  { %14 = vsyncpa [#allocation4], 0 }
   0x3   :  { %16 = vsyncpa [#allocation4 + $0x1], 0  ;;  %s931_s18 = smov 0   ;;  %s933_s19 = smov 0  }
   0x4   :  { %s935_s20 = smov 0   ;;  %s937_s21 = smov 0  }
   0x5   :  { %s939_s22 = smov 0   ;;  %s941_s23 = smov 0  }
   0x6 LB: > { %s677_s24 = sadd.s32 4294967295, %s891_s23   ;;  %s678_s25 = sadd.s32 4294967294, %s891_s23   ;;  %s891_s23 = sphi %s941_s23, %s22_s23   ;;  %s887_s22 = sphi %s939_s22, %s1214_s22   ;;  %s883_s21 = sphi %s937_s21, %s1213_s21   ;;  %s879_s20 = sphi %s935_s20, %s1212_s20   ;;  %s875_s19 = sphi %s933_s19, %s1211_s19   ;;  %s871_s18 = sphi %s931_s18, %s1210_s18  }
   0x7   : > { %s34_s26 = sadd.s32 1, %s887_s22  ;;  %s113_s27 = sadd.s32 1, %s879_s20 }
   0x8   : > { %p36_p0 = scmp.ge.s32.totalorder %s34_s26, 2  ;;  %p120_p1 = scmp.ne.s32.totalorder %s879_s20, %s875_s19 }
   0x9   : > { %p121_p2 = scmp.eq.s32.totalorder %s891_s23, 0  ;;  %p126_p3 = scmp.ne.s32.totalorder %s875_s19, %s871_s18 }
   0xa   : > { %s1216_s26 = smov (%p36_p0, %s34_s26), 0  ;;  %p127_p5 = scmp.eq.s32.totalorder %s677_s24, 0 }
   0xb   : > { %p972_p4 = por %p121_p2, %p120_p1  ;;  %s108_s29 = ssub.s32 %s887_s22, %s1216_s26 }
   0xc   : > { %p152_p6 = scmp.eq.s32.totalorder %s677_s24, 1  ;;  %p111_p7 = scmp.eq.s32.totalorder %s108_s29, 0 }
   0xd   : > { %p978_p8 = por %p127_p5, %p126_p3  ;;  %p158_p10 = scmp.eq.s32.totalorder %s678_s25, 1 }
   0xe   : > { %p982_p9 = por %p152_p6, %p120_p1  ;;  %p720_p13 = scmp.lt.s32.totalorder %s891_s23, 2 }
   0xf   : > { %s987_s7 = scalar_select %p111_p7, %s879_s20, %s113_s27  }
  0x10   : > { %s1203_s6 = scalar_select %p982_p9, 1, 0 }
  0x11   : > { %p989_p11 = por %p158_p10, %p126_p3  ;;  %s223_s9 = sand.u32 1, %s879_s20  }
  0x12   : > { %s681_s10 = sshll.u32 %s223_s9, 6  ;;  %s702_s11 = sshll.u32 %s887_s22, 10 }
  0x13   : > { %s1204_s8 = scalar_select %p989_p11, 1, 0 }
  0x14   : > { %s1000_s14 = scalar_lea.hbm %s1197_s3, %s702_s11  ;;  %s227_s15 = scalar_lea.vmem [#allocation2], %s681_s10 }
  0x15   : > { %s236_s16 = sshll.u32 %s227_s15, 4  ;;  %p1006_p0 = pnand %p720_p13, %p972_p4  ;;  %s1002_s16 = int_to_ptr.vmem [resolvable:$true] %s236_s16 }
  0x16   : > { %s1011_s24 = scalar_lea.sflag [#allocation3], %s223_s9  ;;  %s779_s25 = scalar_lea.hbm %s1000_s14, 1024 }
  0x17   : > { %p780_p2 = scmp.ne.s32.totalorder %s1000_s14, %s779_s25  ;;  %p781_p3 = pneg %p1006_p0 }
  0x18   : > { %s784_s28 = scalar_lea.hbm %s1197_s3, 2048  ;;  %p785_p4 = scmp.lt.u32.totalorder %s1000_s14, %s1197_s3 }
  0x19   : > { %p782_p5 = pnand %p781_p3, %p780_p2  ;;  %p786_p7 = scmp.lt.u32.totalorder %s784_s28, %s779_s25 }
  0x1a   : > { %p788_p13 = scmp.lt.u32.totalorder %s779_s25, %s1000_s14 }
  0x1b   : > { %p783_p6 = pneg %p782_p5  ;;  %p787_p10 = por %p786_p7, %p785_p4 }
  0x1d   : > { %p789_p12 = por %p788_p13, %p787_p10 }
  0x1f   : > { %p790_p1 = pnand %p789_p12, %p783_p6 }
  0x21   : > { %793 = shalt.err (!%p790_p1)
}
  0x22   : > { %s794_s9 = scalar_lea.vmem %s1002_s16, 1024  ;;  %s893_s12 = smov [#allocation2]  }
  0x23   : > { %p795_p2 = scmp.ne.s32.totalorder %s1002_s16, %s794_s9  ;;  %s799_s13 = sshll.u32 %s893_s12, 4  ;;  %s800_s13 = int_to_ptr.vmem [resolvable:$false] %s799_s13 }
  0x24   : > { %s801_s15 = scalar_lea.vmem %s800_s13, 2048  ;;  %p802_p9 = scmp.lt.s32.totalorder %s1002_s16, %s800_s13 }
  0x25   : > { %p797_p5 = pnand %p795_p2, %p781_p3  ;;  %p803_p4 = scmp.lt.s32.totalorder %s801_s15, %s794_s9 }
  0x27   : > { %p798_p11 = pneg %p797_p5  ;;  %p804_p7 = por %p803_p4, %p802_p9 }
  0x29   : > { %p805_p10 = pnand %p804_p7, %p798_p11 }
  0x2b   : > { %808 = shalt.err (!%p805_p10)
}
  0x2c   : > { %s894_s25 = smov 256   ;;  %s895_s27 = smov 16  }
  0x2d   : > { %715 = dma.hbm_to_vmem [thread:$0]  (!%p1006_p0), %s1000_s14, 1024, %s1002_s16, %s1011_s24, %s894_s25, %s894_s25, %s895_s27  }
  0x2e   : > { %p244_p12 = scmp.lt.s32.totalorder %s891_s23, 3  ;;  %p1206_p1 = scmp.ge.s32.totalorder %s891_s23, 1 }
  0x30   : > { %p245_p3 = pnand %p1206_p1, %p244_p12 }
  0x31   : > { %s1043_s29 = sand.u32 (!%p245_p3), 1, %s875_s19  }
  0x32   : > { %248 = sbr.rel (%p245_p3) target bundleno = 449 (0x1c1), region = 36  ;;  %s685_s28 = sshll.u32 (!%p245_p3), %s1043_s29, 6 }
  0x33   : > { %s251_s10 = scalar_lea.sflag (!%p245_p3), [#allocation3], %s1043_s29  ;;  %s1049_s11 = scalar_lea.vmem (!%p245_p3), [#allocation2], %s685_s28 }
  0x39   : > { %862 = dma.done.wait (%p978_p8), %s251_s10, 1024  }
  0x3a   : > { %864 = vsyncadd (%p978_p8), %s251_s10, 4294966272  ;;  %p296_p9 = scmp.lt.s32.totalorder %s883_s21, 1  ;;  %v896_v0 = vmov 0.0   ;;  %v897_v1 = vmov 0   ;;  %vm356_vm0 = vcmask 1043456   ;;  %v317_v4 = vld [vmem:[%s1196_s2] sm:$0xff] }
  0x3b   : > { %425 = vmatprep.mubr.f32.mxu0 %v896_v0  ;;  %437 = vmatprep.mubr.f32.mxu1 %v896_v0  ;;  %v312_v5 = vld [vmem:[%s1195_s1] sm:$0xff]  ;;  %vm343_vm1 = vcmask 31744   ;;  %v314_v6 = vld [vmem:[%s1195_s1 + $0x10] sm:$0xff]  ;;  %v318_v8 = vld [vmem:[%s1196_s2 + $0x8] sm:$0xff]  ;;  %vm478_vm2 = vcmask 7168   ;;  %s524_s12 = scalar_lea.sflag [#allocation4], %s1043_s29 }
  0x3c   : > { %s1057_s14 = scalar_select %p296_p9, %s883_s21, 1  ;;  %776 = vset.pattern.permute.xlu0 %v897_v1  ;;  %777 = vset.pattern.permute.xlu1 %v897_v1  ;;  %v319_v7 = vld [vmem:[%s1196_s2 + $0x10] sm:$0xff]  ;;  %v313_v9 = vld [vmem:[%s1195_s1 + $0x8] sm:$0xff]  ;;  %v315_v10 = vld [vmem:[%s1195_s1 + $0x18] sm:$0xff] }
  0x3d   : > { %323 = vperm.xlu0 %776, %v317_v4   ;;  %333 = vperm.xlu1 %777, %v319_v7   ;;  %v320_v11 = vld [vmem:[%s1196_s2 + $0x18] sm:$0xff]  ;;  %v450_v15 = vld [vmem:[%s1049_s11] sm:$0xff]  ;;  %v451_v20 = vld [vmem:[%s1049_s11 + $0x8] sm:$0xff]  ;;  %p1207_p11 = scmp.ne.s32.totalorder %s1203_s6, 0  ;;  %s898_s15 = smov [#allocation5]  }
  0x3e   : > { %s703_s16 = sshll.u32 %s1057_s14, 3  ;;  %s704_s27 = sshll.u32 %s1057_s14, 5  ;;  %v454_v17 = vld [vmem:[%s1049_s11 + $0x20] sm:$0xff]  ;;  %v455_v23 = vld [vmem:[%s1049_s11 + $0x28] sm:$0xff]  ;;  %v452_v33 = vld [vmem:[%s1049_s11 + $0x10] sm:$0xff] }
  0x3f   : > { %s303_s9 = scalar_lea.vmem %s1194_s0, %s703_s16  ;;  %s1095_s17 = scalar_lea.vmem %s1199_s5, %s704_s27  ;;  %v456_v35 = vld [vmem:[%s1049_s11 + $0x30] sm:$0xff]  ;;  %v453_v41 = vld [vmem:[%s1049_s11 + $0x18] sm:$0xff] }
  0x40   : > { %v316_v2 = vld [vmem:[%s303_s9] sm:$0xff]  ;;  %479 = vst.msk [vmem:[%s1095_s17] sm:$0xff] %vm478_vm2, %v896_v0  ;;  %480 = vst.msk [vmem:[%s1095_s17 + $0x8] sm:$0xff] %vm478_vm2, %v896_v0  ;;  %s287_s14 = scalar_lea.vmem [#allocation5], %s685_s28  ;;  %v457_v43 = vld [vmem:[%s1049_s11 + $0x38] sm:$0xff]  ;;  %s705_s11 = sshll.u32 %s883_s21, 10 }
  0x41   : > { %v342_v3 = vcombine.high %v316_v2, %v316_v2  ;;  %328 = vperm.xlu0 %776, %v318_v8   ;;  %338 = vperm.xlu1 %777, %v320_v11   ;;  %481 = vst.msk [vmem:[%s1095_s17 + $0x10] sm:$0xff] %vm478_vm2, %v896_v0  ;;  %482 = vst.msk [vmem:[%s1095_s17 + $0x18] sm:$0xff] %vm478_vm2, %v896_v0  ;;  %s544_s28 = sshll.u32 %s287_s14, 4  ;;  %s1121_s30 = scalar_lea.hbm %s1198_s4, %s705_s11  ;;  %s1115_s28 = int_to_ptr.vmem [resolvable:$true] %s544_s28 }
  0x42   : > { %s809_s13 = scalar_lea.vmem %s1115_s28, 1024  ;;  %s813_s25 = sshll.u32 %s898_s15, 4  ;;  %s814_s25 = int_to_ptr.vmem [resolvable:$false] %s813_s25 }
  0x43   : > { %691 = vmatprep.subr.msk.mxu0 %vm356_vm0, %v342_v3  ;;  %706 = vmatprep.subr.msk.mxu1 %vm356_vm0, %v342_v3  ;;  %p810_p8 = scmp.ne.s32.totalorder %s1115_s28, %s809_s13  ;;  %s815_s27 = scalar_lea.vmem %s814_s25, 2048 }
  0x44   : > { %692 = vmatpush1.msk.msra.mxu0 %vm356_vm0, %v316_v2  ;;  %707 = vmatpush1.msk.msra.mxu1 %vm356_vm0, %v316_v2  ;;  %p816_p13 = scmp.lt.s32.totalorder %s1115_s28, %s814_s25  ;;  %p817_p2 = scmp.lt.s32.totalorder %s815_s27, %s809_s13 }
  0x45   : > { %693 = vmatmul.mubr.msk.f32.vlgmr.msra.gmra.mrb[0].mxu0 %vm343_vm1, %v312_v5  ;;  %695 = vmatmul.mubr.msk.f32.vlgmr.msra.gmra.mrb[0].mxu1 %vm343_vm1, %v314_v6  ;;  %p811_p0 = pnand %p810_p8, %p1207_p11 }
  0x46   : > { %431 = vmatprep.mubr.f32.mxu0 %v896_v0  ;;  %443 = vmatprep.mubr.f32.mxu1 %v896_v0  ;;  %p818_p5 = por %p817_p2, %p816_p13 }
  0x47   : > { %p812_p6 = pneg %p811_p0 }
  0x49   : > { %694 = vmatmul.mubr.msk.f32.gmra.mrb[2].mxu0 %vm343_vm1, %v313_v9  ;;  %696 = vmatmul.mubr.msk.f32.gmra.mrb[2].mxu1 %vm343_vm1, %v315_v10  ;;  %p819_p4 = pnand %p818_p5, %p812_p6 }
  0xbc   : > { %v334_v12 = vpop.permute.xlu1 %333  ;;  %v324_v13 = vpop.permute.xlu0 %323 }
  0xc0   : > { %v339_v26 = vpop.permute.xlu1 %338  ;;  %v329_v28 = vpop.permute.xlu0 %328 }
 0x118   : > { %v427_v14 = vpop.f32.mrb[0].mxu0  ;;  %v439_v16 = vpop.f32.mrb[0].mxu1 }
 0x119   : > { %v428_v18 = vadd.f32 %v427_v14, %v324_v13  ;;  %v429_v19 = vpop.f32.mrb[1].mxu0  ;;  %v440_v21 = vadd.f32 %v439_v16, %v334_v12  ;;  %v441_v22 = vpop.f32.mrb[1].mxu1 }
 0x11a   : > { %v430_v24 = vadd.f32 %v429_v19, %v324_v13  ;;  %v442_v25 = vadd.f32 %v441_v22, %v334_v12 }
 0x11b   : > { %v458_v27 = vadd.f32 %v450_v15, %v428_v18  ;;  %v462_v29 = vadd.f32 %v454_v17, %v440_v21 }
 0x11c   : > { %v459_v30 = vadd.f32 %v451_v20, %v430_v24  ;;  %v463_v31 = vadd.f32 %v455_v23, %v442_v25  ;;  %v433_v32 = vpop.f32.mrb[2].mxu0  ;;  %v445_v34 = vpop.f32.mrb[2].mxu1  ;;  %v487_v36 = vadd.f32 %v430_v24, %v428_v18  ;;  %v493_v37 = vadd.f32 %v442_v25, %v440_v21 }
 0x11d   : > { %466 = vst [vmem:[%s287_s14] sm:$0xff] %v458_v27  ;;  %470 = vst [vmem:[%s287_s14 + $0x20] sm:$0xff] %v462_v29  ;;  %v434_v38 = vadd.f32 %v433_v32, %v329_v28  ;;  %v446_v39 = vadd.f32 %v445_v34, %v339_v26  ;;  %v435_v40 = vpop.f32.mrb[3].mxu0  ;;  %v447_v42 = vpop.f32.mrb[3].mxu1 }
 0x11e   : > { %467 = vst [vmem:[%s287_s14 + $0x8] sm:$0xff] %v459_v30  ;;  %471 = vst [vmem:[%s287_s14 + $0x28] sm:$0xff] %v463_v31  ;;  %v436_v44 = vadd.f32 %v435_v40, %v329_v28  ;;  %v448_v45 = vadd.f32 %v447_v42, %v339_v26  ;;  %488 = vadd.xlane.f32.xlu0 %v487_v36 }
 0x11f   : > { %v460_v46 = vadd.f32 %v452_v33, %v434_v38  ;;  %v464_v47 = vadd.f32 %v456_v35, %v446_v39 }
 0x120   : > { %v461_v48 = vadd.f32 %v453_v41, %v436_v44  ;;  %v465_v49 = vadd.f32 %v457_v43, %v448_v45  ;;  %v490_v50 = vadd.f32 %v436_v44, %v434_v38  ;;  %v496_v51 = vadd.f32 %v448_v45, %v446_v39 }
 0x121   : > { %468 = vst [vmem:[%s287_s14 + $0x10] sm:$0xff] %v460_v46  ;;  %472 = vst [vmem:[%s287_s14 + $0x30] sm:$0xff] %v464_v47 }
 0x122   : > { %469 = vst [vmem:[%s287_s14 + $0x18] sm:$0xff] %v461_v48  ;;  %473 = vst [vmem:[%s287_s14 + $0x38] sm:$0xff] %v465_v49  ;;  %491 = vadd.xlane.f32.xlu1 %v490_v50  ;;  %494 = vadd.xlane.f32.xlu0 %v493_v37 }
 0x126   : > { %497 = vadd.xlane.f32.xlu0 %v496_v51 }
 0x127   : > { %822 = shalt.err (!%p819_p4)
}
 0x128   : > { %s823_s21 = scalar_lea.hbm %s1121_s30, 1024  ;;  %s827_s14 = scalar_lea.hbm %s1198_s4, 2048 }
 0x129   : > { %p824_p7 = scmp.ne.s32.totalorder %s1121_s30, %s823_s21  ;;  %p828_p1 = scmp.lt.u32.totalorder %s1121_s30, %s1198_s4 }
 0x12a   : > { %p829_p3 = scmp.lt.u32.totalorder %s827_s14, %s823_s21  ;;  %p831_p8 = scmp.lt.u32.totalorder %s823_s21, %s1121_s30 }
 0x12b   : > { %p825_p10 = pnand %p824_p7, %p1207_p11 }
 0x12c   : > { %p830_p9 = por %p829_p3, %p828_p1 }
 0x12d   : > { %p826_p12 = pneg %p825_p10 }
 0x12e   : > { %p832_p0 = por %p831_p8, %p830_p9 }
 0x130   : > { %p833_p6 = pnand %p832_p0, %p826_p12 }
 0x132   : > { %836 = shalt.err (!%p833_p6)
}
 0x133   : > { %s899_s9 = smov 256   ;;  %s900_s13 = smov 16   ;;  %v483_v52 = vld [vmem:[%s1095_s17] sm:$0xff]  ;;  %v484_v55 = vld [vmem:[%s1095_s17 + $0x8] sm:$0xff]  ;;  %v485_v56 = vld [vmem:[%s1095_s17 + $0x10] sm:$0xff] }
 0x134   : > { %710 = dma.vmem_to_hbm [thread:$0]  (%p1207_p11), %s1115_s28, 1024, %s1121_s30, %s524_s12, %s899_s9, %s899_s9, %s900_s13  }
 0x135   : > { %v486_v61 = vld [vmem:[%s1095_s17 + $0x18] sm:$0xff] }
 0x1ab   : > { %v489_v53 = vpop.xlane.xlu0 %488 }
 0x1ac   : > { %v499_v54 = vadd.f32 %v489_v53, %v483_v52 }
 0x1ae   : > { %504 = vst.msk [vmem:[%s1095_s17] sm:$0xff] %vm478_vm2, %v499_v54 }
 0x1af   : > { %v492_v57 = vpop.xlane.xlu1 %491  ;;  %v495_v58 = vpop.xlane.xlu0 %494 }
 0x1b0   : > { %v500_v59 = vadd.f32 %v492_v57, %v484_v55  ;;  %v501_v60 = vadd.f32 %v495_v58, %v485_v56 }
 0x1b2   : > { %505 = vst.msk [vmem:[%s1095_s17 + $0x8] sm:$0xff] %vm478_vm2, %v500_v59  ;;  %506 = vst.msk [vmem:[%s1095_s17 + $0x10] sm:$0xff] %vm478_vm2, %v501_v60 }
 0x1b3   : > { %v498_v62 = vpop.xlane.xlu0 %497 }
 0x1b4   : > { %v502_v63 = vadd.f32 %v498_v62, %v486_v61 }
 0x1b5   : > { %v511_v0 = vld [vmem:[%s1095_s17] sm:$0xff] }
 0x1b6   : > { %v515_v1 = vmul.f32 0.00390625, %v511_v0  ;;  %507 = vst.msk [vmem:[%s1095_s17 + $0x18] sm:$0xff] %vm478_vm2, %v502_v63 }
 0x1b8   : > { %519 = vst.msk [vmem:[%s1095_s17] sm:$0xff] %vm478_vm2, %v515_v1 }
 0x1b9   : > { %v512_v2 = vld [vmem:[%s1095_s17 + $0x8] sm:$0xff]  ;;  %v513_v3 = vld [vmem:[%s1095_s17 + $0x10] sm:$0xff] }
 0x1ba   : > { %v516_v4 = vmul.f32 0.00390625, %v512_v2  ;;  %v517_v5 = vmul.f32 0.00390625, %v513_v3 }
 0x1bc   : > { %520 = vst.msk [vmem:[%s1095_s17 + $0x8] sm:$0xff] %vm478_vm2, %v516_v4  ;;  %521 = vst.msk [vmem:[%s1095_s17 + $0x10] sm:$0xff] %vm478_vm2, %v517_v5 }
 0x1bd   : > { %v514_v6 = vld [vmem:[%s1095_s17 + $0x18] sm:$0xff] }
 0x1be   : > { %v518_v7 = vmul.f32 0.00390625, %v514_v6 }
 0x1c0   : > { %522 = vst.msk [vmem:[%s1095_s17 + $0x18] sm:$0xff] %vm478_vm2, %v518_v7 }
 0x1c1 PF: > { %s562_s6 = sand.u32 1, %s871_s18   ;;  %p1208_p11 = scmp.ne.s32.totalorder %s1204_s8, 0 }
 0x1c2   : > { %p1209_p13 = scmp.ge.s32.totalorder %s891_s23, 2  ;;  %s563_s29 = scalar_lea.sflag [#allocation4], %s562_s6 }
 0x1c4   : > { %p717_p2 = pnand %p1209_p13, %p1208_p11 }
 0x1c6   : > { %866 = dma.done.wait (!%p717_p2), %s563_s29, 1024  }
 0x1c7   : > { %868 = vsyncadd (!%p717_p2), %s563_s29, 4294966272  ;;  %s22_s23 = sadd.s32 1, %s891_s23   ;;  %s1210_s18 = smov %s875_s19 }
 0x1c8   : > { %p19_p5 = scmp.ge.s32.totalorder %s22_s23, 4   ;;  %s1211_s19 = smov %s879_s20 }
 0x1c9   : > { %s1212_s20 = smov %s987_s7  ;;  %s1213_s21 = smov %s887_s22 }
 0x1ca   : > { %s1214_s22 = smov %s1216_s26  ;;  %21 = sbr.rel (!%p19_p5) target bundleno = 6 (0x6), region = 104 }
 0x1d1   :  { %576 = vsyncpa [#allocation3], 1 }
 0x1d2   :  { %578 = vsyncpa [#allocation3 + $0x1], 1 }
 0x1d3   :  { %579 = vsyncpa [#allocation4], 1 }
 0x1d4   :  { %581 = vsyncpa [#allocation4 + $0x1], 1 }

</bundles_post_ra>
